<compile_context>
chip_gen: v7x
topology: tpu7x:2x2x1
jax: 0.10.0
libtpu: 0.0.40
codegen_flags: <defaults>
</compile_context>

<pallas_src>
import functools

import jax
import jax.numpy as jnp
from jax import lax
from jax.experimental import pallas as pl
from jax.experimental.pallas import tpu as pltpu


def _device_kind() -> str:
    try:
        return jax.devices()[0].device_kind.lower()
    except Exception:
        return ""


def _num_tensorcores() -> int:
    """Best-effort TensorCores-per-device detection (conservative default 1)."""
    kind = _device_kind()
    if any(t in kind for t in ("v5 lite", "v5e", "v6 lite", "v6e")):
        return 1
    if any(t in kind for t in ("v4", "v5p", "v7")):
        return 2
    return 1


def _pick_block_b(b: int, c: int, itemsize: int) -> int:
    """Batch-tile rows: big enough to stream at HBM roofline, sublane-aligned."""
    kind = _device_kind()
    if "v5 lite" in kind or "v5e" in kind:
        budget = 4 << 20          # v5e: 16 MiB default scoped VMEM -> keep 2x tile small
    elif "v7" in kind:
        budget = 12 << 20         # v7x-class: fast HBM, amortize per-step overhead
    else:
        budget = 8 << 20          # v6e and default
    packing = max(1, 4 // max(1, itemsize))   # rows per sublane for this dtype
    align = 8 * packing                        # 8 f32 / 16 bf16 / 32 int8
    tb = budget // max(1, c * itemsize)
    tb = max(align, tb)
    tb -= tb % align
    if b <= tb:
        return b                  # block == full batch dim is always legal
    return int(tb)


def _ls_ce_kernel(pred_ref, tgt_ref, out_ref, acc_ref, *,
                  smoothing: float, true_b: int, block_b: int,
                  tiles_per_core: int, num_tiles: int, needs_mask: bool):
    core = pl.program_id(0)        # "parallel" axis (per-TensorCore partials)
    i = pl.program_id(1)           # "arbitrary" reduction axis over batch tiles

    @pl.when(i == 0)
    def _():
        acc_ref[...] = jnp.zeros_like(acc_ref)

    x = pred_ref[...].astype(jnp.float32)                      # (TB, C)
    tb, nclass = x.shape

    # Logical tile index (may exceed num_tiles-1 when tiles don't divide evenly
    # across cores; the pred index_map clamps the DMA, the mask below zeroes it).
    tile_logical = core * tiles_per_core + i
    tile_clamped = jnp.minimum(tile_logical, num_tiles - 1)

    # Per-tile slice of the resident (padded) target column.
    start = pl.multiple_of(tile_clamped * block_b, block_b)
    tgt = tgt_ref[pl.ds(start, block_b), :]                     # (TB, 1) int32

    # log-sum-exp along classes:  -log_softmax[i, j] = (lse + m) - x[i, j]
    m = jnp.max(x, axis=-1, keepdims=True)                      # (TB, 1)
    lse_m = jnp.log(jnp.sum(jnp.exp(x - m), axis=-1, keepdims=True)) + m

    # Fused label smoothing: loss_i = lse_m - sum_j w_ij * x_ij with
    #   w_ij = s/C everywhere and (1 - s + s/C) at the target column.
    classes = lax.broadcasted_iota(jnp.int32, (tb, nclass), 1)  # (TB, C)
    w_hi = 1.0 - smoothing + smoothing / nclass
    w_lo = smoothing / nclass
    w = jnp.where(classes == tgt, w_hi, w_lo)                   # (TB, C)
    per_ex = lse_m - jnp.sum(w * x, axis=-1, keepdims=True)     # (TB, 1)

    if needs_mask:
        # Only the (TB, 1) per-example losses need masking; jnp.where does not
        # propagate NaN/inf from the unselected (padded-row) branch.
        row_ids = tile_logical * block_b + lax.broadcasted_iota(
            jnp.int32, (tb, 1), 0)
        per_ex = jnp.where(row_ids < true_b, per_ex, 0.0)

    acc_ref[...] += per_ex

    @pl.when(i == pl.num_programs(1) - 1)
    def _():
        total = jnp.sum(acc_ref[...])                           # this core's partial
        out_ref[...] = jnp.full(out_ref.shape, total, dtype=jnp.float32)


def label_smoothing_cross_entropy(pred, target, smoothing: float = 0.1,
                                  block_b: int | None = None,
                                  num_cores: int | None = None):
    """pred: (B, C) float array (f32/bf16); target: (B,) int class indices."""
    b, c = pred.shape
    itemsize = jnp.dtype(pred.dtype).itemsize
    if block_b is None:
        block_b = _pick_block_b(b, c, itemsize)
    if num_cores is None:
        num_cores = _num_tensorcores()
    num_cores = max(1, int(num_cores))

    num_tiles = pl.cdiv(b, block_b)
    num_cores = min(num_cores, num_tiles)
    tiles_per_core = pl.cdiv(num_tiles, num_cores)
    padded_b = num_tiles * block_b
    # Mask needed whenever the processed logical rows exceed the true batch
    # (ragged last tile and/or duplicated clamp tiles on the second core).
    needs_mask = (num_cores * tiles_per_core * block_b != b)

    tgt2d = target.astype(jnp.int32).reshape(b, 1)
    if padded_b > b:
        tgt2d = jnp.pad(tgt2d, ((0, padded_b - b), (0, 0)))

    kernel = functools.partial(
        _ls_ce_kernel, smoothing=float(smoothing), true_b=b, block_b=block_b,
        tiles_per_core=tiles_per_core, num_tiles=num_tiles,
        needs_mask=needs_mask)

    # Explicit scoped-VMEM limit: 2 pipeline buffers x pred tile + 2 x resident
    # targets + accumulator + output blocks + margin, clamped to a safe range.
    pred_tile_bytes = block_b * c * itemsize
    vmem_needed = (2 * pred_tile_bytes + 2 * padded_b * 4 + 4 * block_b
                   + 2 * num_cores * 8 * 128 * 4 + (2 << 20))
    vmem_limit = int(min(48 << 20, max(vmem_needed, 16 << 20)))

    pred_index_map = lambda core, i: (
        jnp.minimum(core * tiles_per_core + i, num_tiles - 1), 0)

    out = pl.pallas_call(
        kernel,
        out_shape=jax.ShapeDtypeStruct((num_cores, 8, 128), jnp.float32),
        grid_spec=pltpu.PrefetchScalarGridSpec(
            num_scalar_prefetch=0,
            grid=(num_cores, tiles_per_core),
            in_specs=[
                pl.BlockSpec((block_b, c), pred_index_map),        # pred tile
                pl.BlockSpec((padded_b, 1), lambda core, i: (0, 0)),  # resident targets
            ],
            out_specs=pl.BlockSpec((1, 8, 128), lambda core, i: (core, 0, 0)),
            scratch_shapes=[pltpu.VMEM((block_b, 1), jnp.float32)],
        ),
        compiler_params=pltpu.CompilerParams(
            dimension_semantics=("parallel", "arbitrary"),
            vmem_limit_bytes=vmem_limit),
    )(pred, tgt2d)

    return jnp.sum(out[:, 0, 0]) / b


def _reference(pred, target, smoothing: float = 0.1):
    # Pure-JAX reference matching the PyTorch module semantics.
    n_classes = pred.shape[-1]
    one_hot = jax.nn.one_hot(target, n_classes, dtype=jnp.float32)
    smooth = one_hot * (1.0 - smoothing) + smoothing / n_classes
    log_sm = jax.nn.log_softmax(pred.astype(jnp.float32), axis=1)
    return jnp.mean(jnp.sum(-smooth * log_sm, axis=1))


if __name__ == "__main__":
    key = jax.random.PRNGKey(0)
    k1, k2, k3, k4, k5, k6 = jax.random.split(key, 6)

    # Case 1: multi-tile grid, auto core count.
    B, C = 16, 32
    pred = jax.random.normal(k1, (B, C), dtype=jnp.float32)
    target = jax.random.randint(k2, (B,), 0, C, dtype=jnp.int32)
    loss = label_smoothing_cross_entropy(pred, target, smoothing=0.1, block_b=8)
    jax.block_until_ready(loss)
    ref = _reference(pred, target, smoothing=0.1)
    assert jnp.allclose(loss, ref, atol=1e-5, rtol=1e-5), (loss, ref)

    # Case 2: ragged batch (B % block_b != 0) -> per-example mask + true-B mean.
    B2, C2 = 13, 32
    pred2 = jax.random.normal(k3, (B2, C2), dtype=jnp.float32)
    target2 = jax.random.randint(k4, (B2,), 0, C2, dtype=jnp.int32)
    loss2 = label_smoothing_cross_entropy(pred2, target2, smoothing=0.1, block_b=8)
    jax.block_until_ready(loss2)
    ref2 = _reference(pred2, target2, smoothing=0.1)
    assert jnp.allclose(loss2, ref2, atol=1e-5, rtol=1e-5), (loss2, ref2)

    # Case 3: bf16 predictions streamed narrow, math in f32 inside the kernel
    # (auto block size -> single full-batch tile).
    pred3 = pred.astype(jnp.bfloat16)
    loss3 = label_smoothing_cross_entropy(pred3, target, smoothing=0.1)
    jax.block_until_ready(loss3)
    ref3 = _reference(pred3, target, smoothing=0.1)
    assert jnp.allclose(loss3, ref3, atol=2e-2, rtol=2e-2), (loss3, ref3)

    # Case 4: explicit 2-core split (exercises the dual-TC code path even on a
    # single-TC chip: the "parallel" axis just runs serially there).
    loss4 = label_smoothing_cross_entropy(pred, target, smoothing=0.1,
                                          block_b=8, num_cores=2)
    jax.block_until_ready(loss4)
    assert jnp.allclose(loss4, ref, atol=1e-5, rtol=1e-5), (loss4, ref)

    # Case 5: 2-core split where tiles don't divide evenly across cores
    # (3 tiles / 2 cores -> one clamped duplicate tile, fully masked) + ragged.
    B5, C5 = 21, 32
    pred5 = jax.random.normal(k5, (B5, C5), dtype=jnp.float32)
    target5 = jax.random.randint(k6, (B5,), 0, C5, dtype=jnp.int32)
    loss5 = label_smoothing_cross_entropy(pred5, target5, smoothing=0.1,
                                          block_b=8, num_cores=2)
    jax.block_until_ready(loss5)
    ref5 = _reference(pred5, target5, smoothing=0.1)
    assert jnp.allclose(loss5, ref5, atol=1e-5, rtol=1e-5), (loss5, ref5)

    print("KERNEL_OK")
</pallas_src>

<mosaic_0001>
module attributes {stable_mosaic.version = 11 : i64} {
  func.func @_ls_ce_kernel(%arg0: i32, %arg1: i32, %arg2: memref<8x32xf32, #tpu.memory_space<vmem>>, %arg3: memref<16x1xi32, #tpu.memory_space<vmem>>, %arg4: memref<1x8x128xf32, #tpu.memory_space<vmem>>, %arg5: memref<8x1xf32, #tpu.memory_space<vmem>>) attributes {dimension_semantics = [#tpu.dimension_semantics<parallel>, #tpu.dimension_semantics<arbitrary>], iteration_bounds = array<i64: 1, 2>, scalar_prefetch = 0 : i64, scratch_operands = 1 : i64, tpu.core_type = #tpu.core_type<tc>, window_params = [{transform_indices = @transform_0, window_bounds = array<i64: 8, 32>}, {pipeline_mode = #tpu.pipeline_mode<synchronous>, transform_indices = @transform_1, window_bounds = array<i64: 16, 1>}, {transform_indices = @transform_2, window_bounds = array<i64: 1, 8, 128>}]} {
    %c0_i32 = arith.constant 0 : i32
    %0 = arith.cmpi eq, %arg1, %c0_i32 : i32
    %1 = arith.extui %0 : i1 to i32
    %c0_i32_0 = arith.constant 0 : i32
    %2 = arith.cmpi ne, %1, %c0_i32_0 : i32
    scf.if %2 {
      %cst_13 = arith.constant 0.000000e+00 : f32
      %36 = vector.broadcast %cst_13 : f32 to vector<8x1xf32>
      %c0_14 = arith.constant 0 : index
      %c0_15 = arith.constant 0 : index
      %37 = vector.load %arg5[%c0_14, %c0_15] : memref<8x1xf32, #tpu.memory_space<vmem>>, vector<8x1xf32>
      tpu.vector_store %arg5[%c0_14, %c0_15], %36 {strides = array<i32>} : memref<8x1xf32, #tpu.memory_space<vmem>>, vector<8x1xf32>,
    } else {
    }
    %c0 = arith.constant 0 : index
    %c0_1 = arith.constant 0 : index
    %3 = vector.load %arg2[%c0, %c0_1] : memref<8x32xf32, #tpu.memory_space<vmem>>, vector<8x32xf32>
    %c2_i32 = arith.constant 2 : i32
    %4 = arith.muli %arg0, %c2_i32 : i32
    %5 = arith.addi %4, %arg1 : i32
    %c1_i32 = arith.constant 1 : i32
    %6 = arith.minsi %5, %c1_i32 : i32
    %c8_i32 = arith.constant 8 : i32
    %7 = arith.muli %6, %c8_i32 : i32
    %8 = tpu.assume_multiple %7, 8 : i32
    %9 = arith.index_cast %8 : i32 to index
    %c0_2 = arith.constant 0 : index
    %10 = vector.load %arg3[%9, %c0_2] : memref<16x1xi32, #tpu.memory_space<vmem>>, vector<8x1xi32>
    %cst = arith.constant dense<0xFF800000> : vector<8xf32>
    %11 = vector.multi_reduction <maximumf>, %3, %cst [1] : vector<8x32xf32> to vector<8xf32>
    %12 = vector.shape_cast %11 : vector<8xf32> to vector<8x1xf32>
    %13 = vector.broadcast %12 : vector<8x1xf32> to vector<8x32xf32>
    %14 = arith.subf %3, %13 : vector<8x32xf32>
    %15 = math.exp %14 : vector<8x32xf32>
    %cst_3 = arith.constant dense<0.000000e+00> : vector<8xf32>
    %16 = vector.multi_reduction <add>, %15, %cst_3 [1] : vector<8x32xf32> to vector<8xf32>
    %17 = vector.shape_cast %16 : vector<8xf32> to vector<8x1xf32>
    %18 = math.log %17 : vector<8x1xf32>
    %19 = arith.addf %18, %12 : vector<8x1xf32>
    %20 = tpu.iota {dimensions = array<i32: 1>} : vector<8x32xi32>
    %21 = vector.broadcast %10 : vector<8x1xi32> to vector<8x32xi32>
    %22 = arith.cmpi eq, %20, %21 : vector<8x32xi32>
    %cst_4 = arith.constant 0.903124988 : f32
    %cst_5 = arith.constant 3.125000e-03 : f32
    %23 = vector.broadcast %cst_4 : f32 to vector<8x32xf32>
    %24 = vector.broadcast %cst_5 : f32 to vector<8x32xf32>
    %25 = arith.select %22, %23, %24 : vector<8x32xi1>, vector<8x32xf32>
    %26 = arith.mulf %25, %3 : vector<8x32xf32>
    %cst_6 = arith.constant dense<0.000000e+00> : vector<8xf32>
    %27 = vector.multi_reduction <add>, %26, %cst_6 [1] : vector<8x32xf32> to vector<8xf32>
    %28 = vector.shape_cast %27 : vector<8xf32> to vector<8x1xf32>
    %29 = arith.subf %19, %28 : vector<8x1xf32>
    %c0_7 = arith.constant 0 : index
    %c0_8 = arith.constant 0 : index
    %30 = vector.load %arg5[%c0_7, %c0_8] : memref<8x1xf32, #tpu.memory_space<vmem>>, vector<8x1xf32>
    %31 = arith.addf %30, %29 : vector<8x1xf32>
    %c0_9 = arith.constant 0 : index
    %c0_10 = arith.constant 0 : index
    %32 = vector.load %arg5[%c0_9, %c0_10] : memref<8x1xf32, #tpu.memory_space<vmem>>, vector<8x1xf32>
    tpu.vector_store %arg5[%c0_9, %c0_10], %31 {strides = array<i32>} : memref<8x1xf32, #tpu.memory_space<vmem>>, vector<8x1xf32>,
    %c1_i32_11 = arith.constant 1 : i32
    %33 = arith.cmpi eq, %arg1, %c1_i32_11 : i32
    %34 = arith.extui %33 : i1 to i32
    %c0_i32_12 = arith.constant 0 : i32
    %35 = arith.cmpi ne, %34, %c0_i32_12 : i32
    scf.if %35 {
      %c0_13 = arith.constant 0 : index
      %c0_14 = arith.constant 0 : index
      %36 = vector.load %arg5[%c0_13, %c0_14] : memref<8x1xf32, #tpu.memory_space<vmem>>, vector<8x1xf32>
      %37 = vector.shape_cast %36 : vector<8x1xf32> to vector<1x8x1xf32>
      %cst_15 = arith.constant dense<0.000000e+00> : vector<1xf32>
      %38 = vector.multi_reduction <add>, %37, %cst_15 [1, 2] : vector<1x8x1xf32> to vector<1xf32>
      %39 = vector.shape_cast %38 : vector<1xf32> to vector<1x1x1xf32>
      %40 = vector.extract %39[0, 0, 0] : f32 from vector<1x1x1xf32>
      %41 = vector.broadcast %40 : f32 to vector<1x8x128xf32>
      %c0_16 = arith.constant 0 : index
      %c0_17 = arith.constant 0 : index
      %c0_18 = arith.constant 0 : index
      %42 = vector.load %arg4[%c0_16, %c0_17, %c0_18] : memref<1x8x128xf32, #tpu.memory_space<vmem>>, vector<1x8x128xf32>
      tpu.vector_store %arg4[%c0_16, %c0_17, %c0_18], %41 {strides = array<i32>} : memref<1x8x128xf32, #tpu.memory_space<vmem>>, vector<1x8x128xf32>,
    } else {
    }
    return
  }
  func.func @transform_0(%arg0: i32, %arg1: i32) -> (i32, i32) {
    %c2_i32 = arith.constant 2 : i32
    %0 = arith.muli %arg0, %c2_i32 : i32
    %1 = arith.addi %0, %arg1 : i32
    %c1_i32 = arith.constant 1 : i32
    %2 = arith.minsi %1, %c1_i32 : i32
    %c0_i32 = arith.constant 0 : i32
    %c0_i32_0 = arith.constant 0 : i32
    return %2, %c0_i32 : i32, i32
  }
  func.func @transform_1(%arg0: i32, %arg1: i32) -> (i32, i32) {
    %c0_i32 = arith.constant 0 : i32
    %c0_i32_0 = arith.constant 0 : i32
    %c0_i32_1 = arith.constant 0 : i32
    return %c0_i32, %c0_i32_0 : i32, i32
  }
  func.func @transform_2(%arg0: i32, %arg1: i32) -> (i32, i32, i32) {
    %c0_i32 = arith.constant 0 : i32
    %c0_i32_0 = arith.constant 0 : i32
    %c0_i32_1 = arith.constant 0 : i32
    return %arg0, %c0_i32, %c0_i32_0 : i32, i32, i32
  }
}

</mosaic_0001>

<bundles_post_ra>
// kernel: tpu_custom_call.1
= control target key start
LH: loop header
LB: loop body
LE: loop exit
PB: predicated region body
PF: predicated region fallthrough
CT: control target
= control target key end

     0   :  { %7 = vsyncpa [#allocation4], 0  ;;  %s422_s9 = smov 0   ;;  %s424_s10 = smov 0   ;;  %s493_s0 = inlined_call_operand.vmem [shape: f32[16,32], index: 0, kind: input, shape index: {}]   ;;  %s494_s1 = inlined_call_operand.vmem [shape: s32[16,1], index: 1, kind: input, shape index: {}]   ;;  %s495_s2 = inlined_call_operand.hbm [shape: f32[1,8,128], index: 2, kind: output, shape index: {}]  }
   0x1   :  { %s426_s11 = smov 0  }
   0x2 LB: > { %s293_s12 = sadd.s32 4294967295, %s401_s11   ;;  %s22_s13 = sadd.s32 1, %s397_s10  ;;  %s401_s11 = sphi %s426_s11, %s13_s11   ;;  %s397_s10 = sphi %s424_s10, %s498_s10   ;;  %s393_s9 = sphi %s422_s9, %s497_s9  }
   0x3   : > { %p23_p0 = scmp.ge.s32.totalorder %s22_s13, 2  ;;  %p296_p1 = scmp.ge.s32.totalorder %s401_s11, 1 }
   0x4   : > { %p140_p2 = scmp.lt.s32.totalorder %s401_s11, 3 }
   0x5   : > { %s500_s13 = smov (%p23_p0, %s22_s13), 0 }
   0x6   : > { %p141_p3 = pnand %p296_p1, %p140_p2 }
   0x7   : > { %p162_p4 = scmp.lt.s32.totalorder (!%p141_p3), %s393_s9, 1  ;;  %p301_p5 = scmp.ne.s32.totalorder (!%p141_p3), %s393_s9, 0 }
   0x8   : > { %144 = sbr.rel (%p141_p3) target bundleno = 584 (0x248), region = 28 }
   0xf   : > { %s163_s14 = scalar_select %p162_p4, %s393_s9, 1 }
  0x10   : > { %175 = sbr.rel (%p301_p5) target bundleno = 23 (0x17), region = 32  ;;  %vm176_vm0 = vcmask (!%p301_p5), 7168   ;;  %v403_v0 = vmov (!%p301_p5), 0.0  }
  0x11   : > { %s165_s15 = scalar_select %p162_p4, %s163_s14, 1 }
  0x12   : > { %177 = vst.msk [vmem:[#allocation2] sm:$0xff] (!%p301_p5), %vm176_vm0, %v403_v0 }
  0x13   : > { %s300_s16 = sshll.u32 %s165_s15, 3 }
  0x14   : > { %s167_s19 = scalar_lea.vmem %s493_s0, %s300_s16 }
  0x17 PF: > { %v178_v1 = vld [vmem:[%s167_s19] sm:$0xff]  ;;  %vm186_vm1 = vcmask 261120   ;;  %v404_v3 = vmov 0   ;;  %s302_s20 = sshll.u32 %s163_s14, 3  ;;  %v199_v7 = vlaneseq  ;;  %v405_v11 = vmov 0.003125  }
  0x18   : > { %v187_v2 = vsel %vm186_vm1, %v178_v1, -inf  ;;  %344 = vset.pattern.permute.xlu0 %v404_v3  ;;  %s184_s23 = scalar_lea.vmem %s494_s1, %s302_s20  ;;  %vm213_vm3 = vcmask 7168   ;;  %p303_p6 = scmp.ne.s32.totalorder %s393_s9, 1 }
  0x19   : > { %188 = vmax.xlane.f32.xlu0 %v187_v2  ;;  %v185_v4 = vld [vmem:[%s184_s23] sm:$0xff]  ;;  %v200_v9 = vand.u32 127, %v199_v7 }
  0x1a   : > { %v211_v22 = vld [vmem:[#allocation2] sm:$0xff] }
  0x2f   : > { %202 = vperm.xlu0 %344, %v185_v4  }
  0xa6   : > { %v189_v5 = vpop.xlane.xlu0 %188 }
  0xa7   : > { %v190_v6 = vsub.f32 %v178_v1, %v189_v5 }
  0xa9   : > { %v191_v8 = vmul.f32 1.442695, %v190_v6 }
  0xab   : > { %345 = vpow2.f32 %v191_v8 }
  0xae   : > { %v203_v10 = vpop.permute.xlu0 %202 }
  0xaf   : > { %vm204_vm2 = vcmp.eq.s32.totalorder %v200_v9, %v203_v10 }
  0xb0   : > { %v205_v12 = vsel %vm204_vm2, 0.903125, %v405_v11 }
  0xb1   : > { %v206_v13 = vmul.f32 %v205_v12, %v178_v1 }
  0xb3   : > { %v207_v16 = vsel %vm186_vm1, %v206_v13, 0.0 }
  0xb5   : > { %v346_v14 = vpop.eup %345 }
  0xb6   : > { %v193_v15 = vsel %vm186_vm1, %v346_v14, 0.0 }
  0xb7   : > { %194 = vadd.xlane.f32.xlu1 %v193_v15 }
  0xbb   : > { %208 = vadd.xlane.f32.xlu1 %v207_v16 }
 0x144   : > { %v195_v17 = vpop.xlane.xlu1 %194 }
 0x145   : > { %347 = vlog2.f32 %v195_v17 }
 0x148   : > { %v209_v20 = vpop.xlane.xlu1 %208 }
 0x14f   : > { %v348_v18 = vpop.eup %347 }
 0x150   : > { %v197_v19 = vmul.f32 0.6931472, %v348_v18 }
 0x152   : > { %v198_v21 = vadd.f32 %v197_v19, %v189_v5  ;;  %218 = sbr.rel (%p303_p6) target bundleno = 559 (0x22f), region = 36 }
 0x154   : > { %v210_v23 = vsub.f32 %v198_v21, %v209_v20 }
 0x156   : > { %v212_v24 = vadd.f32 %v211_v22, %v210_v23 }
 0x158   : > { %214 = vst.msk [vmem:[#allocation2] sm:$0xff] %vm213_vm3, %v212_v24 }
 0x15f   : > { %v219_v25 = vld [vmem:[#allocation2] sm:$0xff] }
 0x160   : > { %v220_v26 = vsel %vm213_vm3, %v219_v25, 0.0 }
 0x161   : > { %221 = vadd.xlane.f32.xlu0 %v220_v26 }
 0x1ee   : > { %v222_v27 = vpop.xlane.xlu0 %221 }
 0x1ef   : > { %v223_v28 = vrot.slane %v222_v27, 4 }
 0x1f1   : > { %v224_v29 = vadd.f32 %v223_v28, %v222_v27 }
 0x1f3   : > { %v225_v30 = vrot.slane %v224_v29, 2 }
 0x1f5   : > { %v226_v31 = vadd.f32 %v225_v30, %v224_v29 }
 0x1f7   : > { %v227_v32 = vrot.slane %v226_v31, 1 }
 0x1f9   : > { %v228_v33 = vadd.f32 %v227_v32, %v226_v31 }
 0x1fb   : > { %308 = vpush %v228_v33 }
 0x22c   : > { %s309_s24 = spop %308 }
 0x22d   : > { %v230_v34 = vstv %s309_s24 }
 0x22e   : > { %231 = vst [vmem:[#allocation3] sm:$0xff] %v230_v34 }
 0x22f PF: > { %p458_p7 = scmp.eq.s32.totalorder %s293_s12, 1  ;;  %s406_s26 = smov [#allocation3]  }
 0x230   : > { %s241_s27 = sshll.u32 %s406_s26, 4  ;;  %s242_s27 = int_to_ptr.vmem [resolvable:$true] %s241_s27 }
 0x231   : > { %s349_s28 = scalar_lea.vmem %s242_s27, 128  ;;  %p356_p11 = scmp.lt.s32.totalorder %s242_s27, %s242_s27 }
 0x232   : > { %p350_p8 = scmp.ne.s32.totalorder %s242_s27, %s349_s28  ;;  %p357_p12 = scmp.lt.s32.totalorder %s349_s28, %s349_s28 }
 0x234   : > { %p351_p9 = pnand %p350_p8, %p458_p7  ;;  %p358_p13 = por %p357_p12, %p356_p11 }
 0x236   : > { %p352_p10 = pneg %p351_p9 }
 0x238   : > { %p359_p0 = pnand %p358_p13, %p352_p10 }
 0x23a   : > { %362 = shalt.err (!%p359_p0)
}
 0x23b   : > { %s363_s3 = scalar_lea.hbm %s495_s2, 128 }
 0x23c   : > { %p364_p1 = scmp.ne.s32.totalorder %s495_s2, %s363_s3  ;;  %p369_p4 = scmp.lt.u32.totalorder %s363_s3, %s495_s2 }
 0x23e   : > { %p365_p2 = pnand %p364_p1, %p458_p7 }
 0x240   : > { %p366_p3 = pneg %p365_p2 }
 0x242   : > { %p371_p5 = pnand %p369_p4, %p366_p3 }
 0x244   : > { %374 = shalt.err (!%p371_p5)
}
 0x245   : > { %311 = dma.vmem_to_hbm [thread:$0]  (%p458_p7), %s242_s27, 128, %s495_s2, [#allocation4]  }
 0x246   : > { %388 = dma.done.wait (%p458_p7), [#allocation4], 128  }
 0x247   : > { %390 = vsyncadd (%p458_p7), [#allocation4], 4294967168 }
 0x248 PF: > { %s13_s11 = sadd.s32 1, %s401_s11   ;;  %s497_s9 = smov %s397_s10 }
 0x249   : > { %p10_p6 = scmp.ge.s32.totalorder %s13_s11, 4   ;;  %s498_s10 = smov %s500_s13 }
 0x24b   :  { %12 = sbr.rel (!%p10_p6) target bundleno = 2 (0x2), region = 65 }
 0x252   :  { %254 = vsyncpa [#allocation4], 1 }
 0x253   :  { %256 = vsyncpa [#allocation4 + $0x1], 1 }

</bundles_post_ra>
